<compile_context>
chip_gen: v7x
topology: tpu7x:2x2x1
jax: 0.10.0
libtpu: 0.0.40
codegen_flags: <defaults>
</compile_context>

<pallas_src>
import functools

import numpy as np
import jax
import jax.numpy as jnp
from jax.experimental import pallas as pl
from jax.experimental.pallas import tpu as pltpu


def _cdiv(a, b):
    return -(-a // b)


def _round_up(a, b):
    return _cdiv(a, b) * b


def _num_tensorcores():
    """Best-effort TensorCore count of device 0 (2 on megacore/v7x, else 1)."""
    try:
        d = jax.devices()[0]
        for attr in ("num_cores", "core_count"):
            v = getattr(d, attr, None)
            if isinstance(v, int) and v > 0:
                return min(int(v), 2)
    except Exception:
        pass
    return 1


def _sigmoid_loss_kernel(idx_ref, ht_ref, pos_out_ref, neg_out_ref,
                         acc_pos_ref, acc_neg_ref, *,
                         eps, e_pos, e_neg, n_pos_tiles, tiles_per_core, tile_e):
    p = pl.program_id(0)                      # "parallel" core-split axis
    i = pl.program_id(1)                      # "arbitrary" reduction axis
    last_i = pl.num_programs(1) - 1

    @pl.when(i == 0)
    def _init():
        acc_pos_ref[...] = jnp.zeros_like(acc_pos_ref)
        acc_neg_ref[...] = jnp.zeros_like(acc_neg_ref)

    n_nodes_pad = ht_ref.shape[1]
    tile_id = p * tiles_per_core + i          # global tile index (scalar)

    h_t = ht_ref[...]                         # (D, Npad), storage dtype (no upcast)
    idx = idx_ref[0]                          # (1, 2*tile_e): [src | dst] on lanes

    # One-hot from a (Npad, 1) iota broadcast against the (1, 2*tile_e) index row
    # (no (N, 2E) iota slab).  One-hot lives in h's storage dtype: exact because
    # every column has a single 1.0 (no accumulation rounding).
    node_iota = jax.lax.broadcasted_iota(jnp.int32, (n_nodes_pad, 1), 0)
    onehot = (node_iota == idx).astype(h_t.dtype)            # (Npad, 2*tile_e)

    # f32 features keep the exact multi-pass path; bf16 runs the MXU natively.
    precision = (jax.lax.Precision.HIGHEST if h_t.dtype == jnp.float32
                 else jax.lax.Precision.DEFAULT)
    # Single fused gather matmul, canonical (M,K)x(K,N) form (h pre-transposed).
    uv = jax.lax.dot_general(h_t, onehot, (((1,), (0,)), ((), ())),
                             precision=precision,
                             preferred_element_type=jnp.float32)  # (D, 2*tile_e)
    u_t = uv[:, :tile_e]
    v_t = uv[:, tile_e:]
    score = jnp.sum(u_t * v_t, axis=0, keepdims=True)        # (1, tile_e)

    lane = jax.lax.broadcasted_iota(jnp.int32, (1, tile_e), 1)
    is_pos = tile_id < n_pos_tiles

    @pl.when(is_pos)
    def _pos():
        # Positive edges: sum_e softplus(-(score_e + eps)).
        mask = (lane + tile_id * tile_e) < e_pos
        z = -(score + eps)
        softplus = jnp.maximum(z, 0.0) + jnp.log(1.0 + jnp.exp(-jnp.abs(z)))
        acc_pos_ref[...] += jnp.where(mask, softplus, 0.0)

    @pl.when(jnp.logical_not(is_pos))
    def _neg():
        # Negative edges (and padding tiles, masked to 0): sum_e score_e.
        mask = (lane + (tile_id - n_pos_tiles) * tile_e) < e_neg
        acc_neg_ref[...] += jnp.where(mask, score, 0.0)

    @pl.when(i == last_i)
    def _flush():
        # One cross-lane reduction per core, single lane-dense (8,128) store.
        pos_out_ref[...] = jnp.broadcast_to(
            jnp.sum(acc_pos_ref[...], keepdims=True), pos_out_ref.shape)
        neg_out_ref[...] = jnp.broadcast_to(
            jnp.sum(acc_neg_ref[...], keepdims=True), neg_out_ref.shape)


def sigmoid_loss_sums(h, pos_src, pos_dst, neg_src, neg_dst, *, eps,
                      max_tile_e=2048, num_parallel=None,
                      work_budget_bytes=6 * 1024 * 1024):
    """Returns (sum_e softplus(-(<h_u,h_v>+eps)) over pos edges,
                sum_e <h_u,h_v>               over neg edges)."""
    n_nodes, d = h.shape
    e_pos = int(pos_src.shape[0])
    e_neg = int(neg_src.shape[0])

    if e_pos == 0 and e_neg == 0:
        z = jnp.zeros((), jnp.float32)
        return z, z

    if num_parallel is None:
        num_parallel = _num_tensorcores()

    n_pad = _round_up(n_nodes, 8)             # sublane-align the contraction dim
    h_bytes = jnp.dtype(h.dtype).itemsize

    # Real per-lane-of-tile_e footprint: one-hot (2*Npad*hbytes) + uv/u/v/prod
    # (5*D f32) + two (8, tile_e)-padded accumulators + double-buffered indices.
    per_lane = 2 * n_pad * h_bytes + 5 * d * 4 + 2 * 8 * 4 + 16
    cap = max(128, (work_budget_bytes // per_lane) // 128 * 128)
    tile_e = min(max_tile_e, cap, max(128, _round_up(max(e_pos, e_neg), 128)))

    n_pos_tiles = _cdiv(e_pos, tile_e)
    n_neg_tiles = _cdiv(e_neg, tile_e)
    n_tiles_raw = n_pos_tiles + n_neg_tiles
    num_parallel_eff = max(1, min(num_parallel, n_tiles_raw))
    tiles_per_core = _cdiv(n_tiles_raw, num_parallel_eff)
    n_tiles_total = num_parallel_eff * tiles_per_core

    # Pack [src | dst] per tile into ONE lane-dense int32 slab (single BlockSpec).
    def flat(pos_idx, neg_idx):
        parts = [jnp.pad(pos_idx.astype(jnp.int32), (0, n_pos_tiles * tile_e - e_pos)),
                 jnp.pad(neg_idx.astype(jnp.int32), (0, n_neg_tiles * tile_e - e_neg))]
        extra = (n_tiles_total - n_tiles_raw) * tile_e
        if extra:
            parts.append(jnp.zeros((extra,), jnp.int32))
        return jnp.concatenate(parts).reshape(n_tiles_total, tile_e)

    idx_all = jnp.concatenate([flat(pos_src, neg_src), flat(pos_dst, neg_dst)],
                              axis=1).reshape(n_tiles_total, 1, 2 * tile_e)

    # h transposed ONCE in the wrapper (padded node axis with zeros) so the
    # in-kernel dot is a plain last-dim contraction; streamed in storage dtype.
    h_t = jnp.pad(h, ((0, n_pad - n_nodes), (0, 0))).T       # (D, Npad)

    kernel = functools.partial(
        _sigmoid_loss_kernel, eps=float(eps), e_pos=e_pos, e_neg=e_neg,
        n_pos_tiles=n_pos_tiles, tiles_per_core=tiles_per_core, tile_e=tile_e)

    idx_spec = pl.BlockSpec((1, 1, 2 * tile_e),
                            lambda p, i: (p * tiles_per_core + i, 0, 0))
    out_spec = pl.BlockSpec((1, 8, 128), lambda p, i: (p, 0, 0))
    out_shape = (jax.ShapeDtypeStruct((num_parallel_eff, 8, 128), jnp.float32),
                 jax.ShapeDtypeStruct((num_parallel_eff, 8, 128), jnp.float32))

    vmem_need = (2 * d * n_pad * h_bytes + tile_e * per_lane
                 + 4 * num_parallel_eff * 8 * 128 * 4)
    vmem_limit = int(min(max(32 << 20, vmem_need + (8 << 20)), 100 << 20))

    def build(single_buffer_h):
        if single_buffer_h:
            # h never changes across the grid: single-buffer it (halves its VMEM).
            h_spec = pl.BlockSpec((d, n_pad), lambda p, i: (0, 0),
                                  pipeline_mode=pl.Buffered(1))
        else:
            h_spec = pl.BlockSpec((d, n_pad), lambda p, i: (0, 0))
        return pl.pallas_call(
            kernel,
            out_shape=out_shape,
            grid_spec=pltpu.PrefetchScalarGridSpec(
                num_scalar_prefetch=0,
                grid=(num_parallel_eff, tiles_per_core),
                in_specs=[idx_spec, h_spec],
                out_specs=[out_spec, out_spec],
                scratch_shapes=[pltpu.VMEM((1, tile_e), jnp.float32),
                                pltpu.VMEM((1, tile_e), jnp.float32)]),
            compiler_params=pltpu.CompilerParams(
                dimension_semantics=("parallel", "arbitrary"),
                vmem_limit_bytes=vmem_limit))

    try:
        pos_out, neg_out = build(True)(idx_all, h_t)
    except Exception:
        # Fallback for jax versions where Buffered(1) pipeline mode is unsupported.
        pos_out, neg_out = build(False)(idx_all, h_t)

    return jnp.sum(pos_out[:, 0, 0]), jnp.sum(neg_out[:, 0, 0])


class SigmoidLossPallas:
    """JAX/Pallas port of SigmoidLoss.

    The DGL graph `g` of the original __init__ is replaced by its statistics
    (num_nodes, num_edges); pos/neg graphs are passed as (src, dst) int32 edge
    index arrays.
    """

    def __init__(self, num_nodes, num_edges, balance=True):
        self.balance = balance
        self.prob = num_edges / (num_nodes ** 2 - num_nodes) * 2
        # Guard the degenerate dense-graph case (prob >= 1) where log(1-prob) blows up.
        self.eps = -np.log(max(1.0 - self.prob, float(np.finfo(np.float32).tiny)))

    def __call__(self, block_outputs, pos_src, pos_dst, neg_src, neg_dst):
        n_pos = int(pos_src.shape[0])
        n_neg = int(neg_src.shape[0])
        pos_sum, neg_sum = sigmoid_loss_sums(
            block_outputs, pos_src, pos_dst, neg_src, neg_dst, eps=self.eps)
        loss_edges = pos_sum / n_pos if n_pos > 0 else jnp.zeros((), jnp.float32)
        loss_nonedges = neg_sum / n_neg if n_neg > 0 else jnp.zeros((), jnp.float32)
        if self.balance:
            return loss_edges + loss_nonedges
        ratio = (n_neg / n_pos) if n_pos > 0 else 0.0
        return loss_edges + loss_nonedges * ratio


if __name__ == "__main__":
    key = jax.random.PRNGKey(0)
    k_feat, k_ps, k_pd, k_ns, k_nd = jax.random.split(key, 5)

    num_nodes = 8      # nodes in the sampled blocks
    feat_dim = 32      # hidden dim of block_outputs
    n_pos_edges = 16   # positive-graph edges
    n_neg_edges = 16   # negative-graph edges

    block_outputs = jax.random.normal(k_feat, (num_nodes, feat_dim), dtype=jnp.float32)
    pos_src = jax.random.randint(k_ps, (n_pos_edges,), 0, num_nodes, dtype=jnp.int32)
    pos_dst = jax.random.randint(k_pd, (n_pos_edges,), 0, num_nodes, dtype=jnp.int32)
    neg_src = jax.random.randint(k_ns, (n_neg_edges,), 0, num_nodes, dtype=jnp.int32)
    neg_dst = jax.random.randint(k_nd, (n_neg_edges,), 0, num_nodes, dtype=jnp.int32)

    # `g` statistics are only used to derive self.eps (as in the torch __init__).
    loss_mod = SigmoidLossPallas(num_nodes=num_nodes, num_edges=n_pos_edges, balance=True)

    def ref_loss(h):
        h32 = h.astype(jnp.float32)
        pos_score = jnp.sum(h32[pos_src] * h32[pos_dst], axis=-1)
        neg_score = jnp.sum(h32[neg_src] * h32[neg_dst], axis=-1)
        return (-jnp.mean(jnp.log((1.0 + jnp.exp(-pos_score - loss_mod.eps)) ** -1))
                + jnp.mean(neg_score))

    # f32 storage dtype: exact (HIGHEST-precision) gather path.
    loss_f32 = jax.block_until_ready(
        loss_mod(block_outputs, pos_src, pos_dst, neg_src, neg_dst))
    ref_f32 = ref_loss(block_outputs)
    assert np.allclose(np.asarray(loss_f32), np.asarray(ref_f32),
                       rtol=1e-3, atol=1e-3), (float(loss_f32), float(ref_f32))

    # bf16 storage dtype: native-rate MXU gather path.
    h_bf16 = block_outputs.astype(jnp.bfloat16)
    loss_bf16 = jax.block_until_ready(
        loss_mod(h_bf16, pos_src, pos_dst, neg_src, neg_dst))
    ref_bf16 = ref_loss(h_bf16)
    assert np.allclose(np.asarray(loss_bf16), np.asarray(ref_bf16),
                       rtol=1e-2, atol=1e-2), (float(loss_bf16), float(ref_bf16))

    print("KERNEL_OK")
</pallas_src>

<mosaic_0001>
module attributes {stable_mosaic.version = 11 : i64} {
  func.func @_sigmoid_loss_kernel(%arg0: i32, %arg1: i32, %arg2: memref<1x1x256xi32, #tpu.memory_space<vmem>>, %arg3: memref<32x8xf32, #tpu.memory_space<vmem>>, %arg4: memref<1x8x128xf32, #tpu.memory_space<vmem>>, %arg5: memref<1x8x128xf32, #tpu.memory_space<vmem>>, %arg6: memref<1x128xf32, #tpu.memory_space<vmem>>, %arg7: memref<1x128xf32, #tpu.memory_space<vmem>>) attributes {dimension_semantics = [#tpu.dimension_semantics<parallel>, #tpu.dimension_semantics<arbitrary>], iteration_bounds = array<i64: 1, 2>, scalar_prefetch = 0 : i64, scratch_operands = 2 : i64, tpu.core_type = #tpu.core_type<tc>, window_params = [{transform_indices = @transform_0, window_bounds = array<i64: 1, 1, 256>}, {pipeline_mode = #tpu.pipeline_mode<synchronous>, transform_indices = @transform_1, window_bounds = array<i64: 32, 8>}, {transform_indices = @transform_2, window_bounds = array<i64: 1, 8, 128>}, {transform_indices = @transform_3, window_bounds = array<i64: 1, 8, 128>}]} {
    %c0_i32 = arith.constant 0 : i32
    %0 = arith.cmpi eq, %arg1, %c0_i32 : i32
    %1 = arith.extui %0 : i1 to i32
    %c0_i32_0 = arith.constant 0 : i32
    %2 = arith.cmpi ne, %1, %c0_i32_0 : i32
    scf.if %2 {
      %cst_10 = arith.constant 0.000000e+00 : f32
      %30 = vector.broadcast %cst_10 : f32 to vector<1x128xf32>
      %c0_11 = arith.constant 0 : index
      %c0_12 = arith.constant 0 : index
      %31 = vector.load %arg6[%c0_11, %c0_12] : memref<1x128xf32, #tpu.memory_space<vmem>>, vector<1x128xf32>
      tpu.vector_store %arg6[%c0_11, %c0_12], %30 {strides = array<i32>} : memref<1x128xf32, #tpu.memory_space<vmem>>, vector<1x128xf32>,
      %cst_13 = arith.constant 0.000000e+00 : f32
      %32 = vector.broadcast %cst_13 : f32 to vector<1x128xf32>
      %c0_14 = arith.constant 0 : index
      %c0_15 = arith.constant 0 : index
      %33 = vector.load %arg7[%c0_14, %c0_15] : memref<1x128xf32, #tpu.memory_space<vmem>>, vector<1x128xf32>
      tpu.vector_store %arg7[%c0_14, %c0_15], %32 {strides = array<i32>} : memref<1x128xf32, #tpu.memory_space<vmem>>, vector<1x128xf32>,
    } else {
    }
    %c2_i32 = arith.constant 2 : i32
    %3 = arith.muli %arg0, %c2_i32 : i32
    %4 = arith.addi %3, %arg1 : i32
    %c0 = arith.constant 0 : index
    %c0_1 = arith.constant 0 : index
    %5 = vector.load %arg3[%c0, %c0_1] : memref<32x8xf32, #tpu.memory_space<vmem>>, vector<32x8xf32>
    %c0_2 = arith.constant 0 : index
    %c0_3 = arith.constant 0 : index
    %c0_4 = arith.constant 0 : index
    %6 = vector.load %arg2[%c0_2, %c0_3, %c0_4] : memref<1x1x256xi32, #tpu.memory_space<vmem>>, vector<1x1x256xi32>
    %7 = vector.shape_cast %6 : vector<1x1x256xi32> to vector<1x256xi32>
    %8 = tpu.iota {dimensions = array<i32: 0>} : vector<8x1xi32>
    %9 = vector.broadcast %8 : vector<8x1xi32> to vector<8x256xi32>
    %10 = vector.broadcast %7 : vector<1x256xi32> to vector<8x256xi32>
    %11 = arith.cmpi eq, %9, %10 : vector<8x256xi32>
    %12 = arith.extui %11 : vector<8x256xi1> to vector<8x256xi32>
    %13 = arith.sitofp %12 : vector<8x256xi32> to vector<8x256xf32>
    %cst = arith.constant dense<0.000000e+00> : vector<32x256xf32>
    %14 = tpu.matmul %5, %13, %cst {dimension_numbers = #tpu.dot_dimension_numbers<[1], [0], [0], [1], [0, 0, 1, 1], [], []>, precision = #tpu.contract_precision<fp32>} : vector<32x8xf32>, vector<8x256xf32>, vector<32x256xf32> -> vector<32x256xf32>
    %15 = vector.extract_strided_slice %14 {offsets = [0, 0], sizes = [32, 128], strides = [1, 1]} : vector<32x256xf32> to vector<32x128xf32>
    %16 = vector.extract_strided_slice %14 {offsets = [0, 128], sizes = [32, 128], strides = [1, 1]} : vector<32x256xf32> to vector<32x128xf32>
    %17 = arith.mulf %15, %16 : vector<32x128xf32>
    %cst_5 = arith.constant dense<0.000000e+00> : vector<128xf32>
    %18 = vector.multi_reduction <add>, %17, %cst_5 [0] : vector<32x128xf32> to vector<128xf32>
    %19 = vector.shape_cast %18 : vector<128xf32> to vector<1x128xf32>
    %20 = tpu.iota {dimensions = array<i32: 1>} : vector<1x128xi32>
    %c1_i32 = arith.constant 1 : i32
    %21 = arith.cmpi slt, %4, %c1_i32 : i32
    %22 = arith.extui %21 : i1 to i32
    %c0_i32_6 = arith.constant 0 : i32
    %23 = arith.cmpi ne, %22, %c0_i32_6 : i32
    scf.if %23 {
      %c128_i32 = arith.constant 128 : i32
      %30 = arith.muli %4, %c128_i32 : i32
      %31 = vector.broadcast %30 : i32 to vector<1x128xi32>
      %32 = arith.addi %20, %31 : vector<1x128xi32>
      %c16_i32 = arith.constant 16 : i32
      %33 = vector.broadcast %c16_i32 : i32 to vector<1x128xi32>
      %34 = arith.cmpi slt, %32, %33 : vector<1x128xi32>
      %cst_10 = arith.constant 0.847297847 : f32
      %35 = vector.broadcast %cst_10 : f32 to vector<1x128xf32>
      %36 = arith.addf %19, %35 : vector<1x128xf32>
      %cst_11 = arith.constant 0.000000e+00 : f32
      %37 = vector.broadcast %cst_11 : f32 to vector<1x128xf32>
      %38 = arith.subf %37, %36 : vector<1x128xf32>
      %cst_12 = arith.constant 0.000000e+00 : f32
      %39 = vector.broadcast %cst_12 : f32 to vector<1x128xf32>
      %40 = arith.maximumf %38, %39 : vector<1x128xf32>
      %41 = math.absf %38 : vector<1x128xf32>
      %cst_13 = arith.constant 0.000000e+00 : f32
      %42 = vector.broadcast %cst_13 : f32 to vector<1x128xf32>
      %43 = arith.subf %42, %41 : vector<1x128xf32>
      %44 = math.exp %43 : vector<1x128xf32>
      %cst_14 = arith.constant 1.000000e+00 : f32
      %45 = vector.broadcast %cst_14 : f32 to vector<1x128xf32>
      %46 = arith.addf %45, %44 : vector<1x128xf32>
      %47 = math.log %46 : vector<1x128xf32>
      %48 = arith.addf %40, %47 : vector<1x128xf32>
      %c0_15 = arith.constant 0 : index
      %c0_16 = arith.constant 0 : index
      %49 = vector.load %arg6[%c0_15, %c0_16] : memref<1x128xf32, #tpu.memory_space<vmem>>, vector<1x128xf32>
      %cst_17 = arith.constant 0.000000e+00 : f32
      %50 = vector.broadcast %cst_17 : f32 to vector<1x128xf32>
      %51 = arith.select %34, %48, %50 : vector<1x128xi1>, vector<1x128xf32>
      %52 = arith.addf %49, %51 : vector<1x128xf32>
      %c0_18 = arith.constant 0 : index
      %c0_19 = arith.constant 0 : index
      %53 = vector.load %arg6[%c0_18, %c0_19] : memref<1x128xf32, #tpu.memory_space<vmem>>, vector<1x128xf32>
      tpu.vector_store %arg6[%c0_18, %c0_19], %52 {strides = array<i32>} : memref<1x128xf32, #tpu.memory_space<vmem>>, vector<1x128xf32>,
    } else {
    }
    %true = arith.constant true
    %24 = arith.xori %21, %true : i1
    %25 = arith.extui %24 : i1 to i32
    %c0_i32_7 = arith.constant 0 : i32
    %26 = arith.cmpi ne, %25, %c0_i32_7 : i32
    scf.if %26 {
      %c1_i32_10 = arith.constant 1 : i32
      %30 = arith.subi %4, %c1_i32_10 : i32
      %c128_i32 = arith.constant 128 : i32
      %31 = arith.muli %30, %c128_i32 : i32
      %32 = vector.broadcast %31 : i32 to vector<1x128xi32>
      %33 = arith.addi %20, %32 : vector<1x128xi32>
      %c16_i32 = arith.constant 16 : i32
      %34 = vector.broadcast %c16_i32 : i32 to vector<1x128xi32>
      %35 = arith.cmpi slt, %33, %34 : vector<1x128xi32>
      %c0_11 = arith.constant 0 : index
      %c0_12 = arith.constant 0 : index
      %36 = vector.load %arg7[%c0_11, %c0_12] : memref<1x128xf32, #tpu.memory_space<vmem>>, vector<1x128xf32>
      %cst_13 = arith.constant 0.000000e+00 : f32
      %37 = vector.broadcast %cst_13 : f32 to vector<1x128xf32>
      %38 = arith.select %35, %19, %37 : vector<1x128xi1>, vector<1x128xf32>
      %39 = arith.addf %36, %38 : vector<1x128xf32>
      %c0_14 = arith.constant 0 : index
      %c0_15 = arith.constant 0 : index
      %40 = vector.load %arg7[%c0_14, %c0_15] : memref<1x128xf32, #tpu.memory_space<vmem>>, vector<1x128xf32>
      tpu.vector_store %arg7[%c0_14, %c0_15], %39 {strides = array<i32>} : memref<1x128xf32, #tpu.memory_space<vmem>>, vector<1x128xf32>,
    } else {
    }
    %c1_i32_8 = arith.constant 1 : i32
    %27 = arith.cmpi eq, %arg1, %c1_i32_8 : i32
    %28 = arith.extui %27 : i1 to i32
    %c0_i32_9 = arith.constant 0 : i32
    %29 = arith.cmpi ne, %28, %c0_i32_9 : i32
    scf.if %29 {
      %c0_10 = arith.constant 0 : index
      %c0_11 = arith.constant 0 : index
      %30 = vector.load %arg6[%c0_10, %c0_11] : memref<1x128xf32, #tpu.memory_space<vmem>>, vector<1x128xf32>
      %31 = vector.shape_cast %30 : vector<1x128xf32> to vector<1x1x128xf32>
      %cst_12 = arith.constant dense<0.000000e+00> : vector<1xf32>
      %32 = vector.multi_reduction <add>, %31, %cst_12 [1, 2] : vector<1x1x128xf32> to vector<1xf32>
      %33 = vector.shape_cast %32 : vector<1xf32> to vector<1x1x1xf32>
      %34 = vector.extract %33[0, 0, 0] : f32 from vector<1x1x1xf32>
      %35 = vector.broadcast %34 : f32 to vector<1x1xf32>
      %36 = vector.shape_cast %35 : vector<1x1xf32> to vector<1x1x1xf32>
      %37 = vector.broadcast %36 : vector<1x1x1xf32> to vector<1x8x128xf32>
      %c0_13 = arith.constant 0 : index
      %c0_14 = arith.constant 0 : index
      %c0_15 = arith.constant 0 : index
      %38 = vector.load %arg4[%c0_13, %c0_14, %c0_15] : memref<1x8x128xf32, #tpu.memory_space<vmem>>, vector<1x8x128xf32>
      tpu.vector_store %arg4[%c0_13, %c0_14, %c0_15], %37 {strides = array<i32>} : memref<1x8x128xf32, #tpu.memory_space<vmem>>, vector<1x8x128xf32>,
      %c0_16 = arith.constant 0 : index
      %c0_17 = arith.constant 0 : index
      %39 = vector.load %arg7[%c0_16, %c0_17] : memref<1x128xf32, #tpu.memory_space<vmem>>, vector<1x128xf32>
      %40 = vector.shape_cast %39 : vector<1x128xf32> to vector<1x1x128xf32>
      %cst_18 = arith.constant dense<0.000000e+00> : vector<1xf32>
      %41 = vector.multi_reduction <add>, %40, %cst_18 [1, 2] : vector<1x1x128xf32> to vector<1xf32>
      %42 = vector.shape_cast %41 : vector<1xf32> to vector<1x1x1xf32>
      %43 = vector.extract %42[0, 0, 0] : f32 from vector<1x1x1xf32>
      %44 = vector.broadcast %43 : f32 to vector<1x1xf32>
      %45 = vector.shape_cast %44 : vector<1x1xf32> to vector<1x1x1xf32>
      %46 = vector.broadcast %45 : vector<1x1x1xf32> to vector<1x8x128xf32>
      %c0_19 = arith.constant 0 : index
      %c0_20 = arith.constant 0 : index
      %c0_21 = arith.constant 0 : index
      %47 = vector.load %arg5[%c0_19, %c0_20, %c0_21] : memref<1x8x128xf32, #tpu.memory_space<vmem>>, vector<1x8x128xf32>
      tpu.vector_store %arg5[%c0_19, %c0_20, %c0_21], %46 {strides = array<i32>} : memref<1x8x128xf32, #tpu.memory_space<vmem>>, vector<1x8x128xf32>,
    } else {
    }
    return
  }
  func.func @transform_0(%arg0: i32, %arg1: i32) -> (i32, i32, i32) {
    %c2_i32 = arith.constant 2 : i32
    %0 = arith.muli %arg0, %c2_i32 : i32
    %1 = arith.addi %0, %arg1 : i32
    %c0_i32 = arith.constant 0 : i32
    %c0_i32_0 = arith.constant 0 : i32
    %c0_i32_1 = arith.constant 0 : i32
    return %1, %c0_i32, %c0_i32_0 : i32, i32, i32
  }
  func.func @transform_1(%arg0: i32, %arg1: i32) -> (i32, i32) {
    %c0_i32 = arith.constant 0 : i32
    %c0_i32_0 = arith.constant 0 : i32
    %c0_i32_1 = arith.constant 0 : i32
    return %c0_i32, %c0_i32_0 : i32, i32
  }
  func.func @transform_2(%arg0: i32, %arg1: i32) -> (i32, i32, i32) {
    %c0_i32 = arith.constant 0 : i32
    %c0_i32_0 = arith.constant 0 : i32
    %c0_i32_1 = arith.constant 0 : i32
    return %arg0, %c0_i32, %c0_i32_0 : i32, i32, i32
  }
  func.func @transform_3(%arg0: i32, %arg1: i32) -> (i32, i32, i32) {
    %c0_i32 = arith.constant 0 : i32
    %c0_i32_0 = arith.constant 0 : i32
    %c0_i32_1 = arith.constant 0 : i32
    return %arg0, %c0_i32, %c0_i32_0 : i32, i32, i32
  }
}

module attributes {stable_mosaic.version = 11 : i64} {
  func.func @_sigmoid_loss_kernel(%arg0: i32, %arg1: i32, %arg2: memref<1x1x256xi32, #tpu.memory_space<vmem>>, %arg3: memref<32x8xf32, #tpu.memory_space<vmem>>, %arg4: memref<1x8x128xf32, #tpu.memory_space<vmem>>, %arg5: memref<1x8x128xf32, #tpu.memory_space<vmem>>, %arg6: memref<1x128xf32, #tpu.memory_space<vmem>>, %arg7: memref<1x128xf32, #tpu.memory_space<vmem>>) attributes {dimension_semantics = [#tpu.dimension_semantics<parallel>, #tpu.dimension_semantics<arbitrary>], iteration_bounds = array<i64: 1, 2>, scalar_prefetch = 0 : i64, scratch_operands = 2 : i64, tpu.core_type = #tpu.core_type<tc>, window_params = [{transform_indices = @transform_0, window_bounds = array<i64: 1, 1, 256>}, {pipeline_mode = #tpu.pipeline_mode<synchronous>, transform_indices = @transform_1, window_bounds = array<i64: 32, 8>}, {transform_indices = @transform_2, window_bounds = array<i64: 1, 8, 128>}, {transform_indices = @transform_3, window_bounds = array<i64: 1, 8, 128>}]} {
    %c0_i32 = arith.constant 0 : i32
    %0 = arith.cmpi eq, %arg1, %c0_i32 : i32
    %1 = arith.extui %0 : i1 to i32
    %c0_i32_0 = arith.constant 0 : i32
    %2 = arith.cmpi ne, %1, %c0_i32_0 : i32
    scf.if %2 {
      %cst_10 = arith.constant 0.000000e+00 : f32
      %30 = vector.broadcast %cst_10 : f32 to vector<1x128xf32>
      %c0_11 = arith.constant 0 : index
      %c0_12 = arith.constant 0 : index
      %31 = vector.load %arg6[%c0_11, %c0_12] : memref<1x128xf32, #tpu.memory_space<vmem>>, vector<1x128xf32>
      tpu.vector_store %arg6[%c0_11, %c0_12], %30 {strides = array<i32>} : memref<1x128xf32, #tpu.memory_space<vmem>>, vector<1x128xf32>,
      %cst_13 = arith.constant 0.000000e+00 : f32
      %32 = vector.broadcast %cst_13 : f32 to vector<1x128xf32>
      %c0_14 = arith.constant 0 : index
      %c0_15 = arith.constant 0 : index
      %33 = vector.load %arg7[%c0_14, %c0_15] : memref<1x128xf32, #tpu.memory_space<vmem>>, vector<1x128xf32>
      tpu.vector_store %arg7[%c0_14, %c0_15], %32 {strides = array<i32>} : memref<1x128xf32, #tpu.memory_space<vmem>>, vector<1x128xf32>,
    } else {
    }
    %c2_i32 = arith.constant 2 : i32
    %3 = arith.muli %arg0, %c2_i32 : i32
    %4 = arith.addi %3, %arg1 : i32
    %c0 = arith.constant 0 : index
    %c0_1 = arith.constant 0 : index
    %5 = vector.load %arg3[%c0, %c0_1] : memref<32x8xf32, #tpu.memory_space<vmem>>, vector<32x8xf32>
    %c0_2 = arith.constant 0 : index
    %c0_3 = arith.constant 0 : index
    %c0_4 = arith.constant 0 : index
    %6 = vector.load %arg2[%c0_2, %c0_3, %c0_4] : memref<1x1x256xi32, #tpu.memory_space<vmem>>, vector<1x1x256xi32>
    %7 = vector.shape_cast %6 : vector<1x1x256xi32> to vector<1x256xi32>
    %8 = tpu.iota {dimensions = array<i32: 0>} : vector<8x1xi32>
    %9 = vector.broadcast %8 : vector<8x1xi32> to vector<8x256xi32>
    %10 = vector.broadcast %7 : vector<1x256xi32> to vector<8x256xi32>
    %11 = arith.cmpi eq, %9, %10 : vector<8x256xi32>
    %12 = arith.extui %11 : vector<8x256xi1> to vector<8x256xi32>
    %13 = arith.sitofp %12 : vector<8x256xi32> to vector<8x256xf32>
    %cst = arith.constant dense<0.000000e+00> : vector<32x256xf32>
    %14 = tpu.matmul %5, %13, %cst {dimension_numbers = #tpu.dot_dimension_numbers<[1], [0], [0], [1], [0, 0, 1, 1], [], []>, precision = #tpu.contract_precision<fp32>} : vector<32x8xf32>, vector<8x256xf32>, vector<32x256xf32> -> vector<32x256xf32>
    %15 = vector.extract_strided_slice %14 {offsets = [0, 0], sizes = [32, 128], strides = [1, 1]} : vector<32x256xf32> to vector<32x128xf32>
    %16 = vector.extract_strided_slice %14 {offsets = [0, 128], sizes = [32, 128], strides = [1, 1]} : vector<32x256xf32> to vector<32x128xf32>
    %17 = arith.mulf %15, %16 : vector<32x128xf32>
    %cst_5 = arith.constant dense<0.000000e+00> : vector<128xf32>
    %18 = vector.multi_reduction <add>, %17, %cst_5 [0] : vector<32x128xf32> to vector<128xf32>
    %19 = vector.shape_cast %18 : vector<128xf32> to vector<1x128xf32>
    %20 = tpu.iota {dimensions = array<i32: 1>} : vector<1x128xi32>
    %c1_i32 = arith.constant 1 : i32
    %21 = arith.cmpi slt, %4, %c1_i32 : i32
    %22 = arith.extui %21 : i1 to i32
    %c0_i32_6 = arith.constant 0 : i32
    %23 = arith.cmpi ne, %22, %c0_i32_6 : i32
    scf.if %23 {
      %c128_i32 = arith.constant 128 : i32
      %30 = arith.muli %4, %c128_i32 : i32
      %31 = vector.broadcast %30 : i32 to vector<1x128xi32>
      %32 = arith.addi %20, %31 : vector<1x128xi32>
      %c16_i32 = arith.constant 16 : i32
      %33 = vector.broadcast %c16_i32 : i32 to vector<1x128xi32>
      %34 = arith.cmpi slt, %32, %33 : vector<1x128xi32>
      %cst_10 = arith.constant 0.847297847 : f32
      %35 = vector.broadcast %cst_10 : f32 to vector<1x128xf32>
      %36 = arith.addf %19, %35 : vector<1x128xf32>
      %cst_11 = arith.constant 0.000000e+00 : f32
      %37 = vector.broadcast %cst_11 : f32 to vector<1x128xf32>
      %38 = arith.subf %37, %36 : vector<1x128xf32>
      %cst_12 = arith.constant 0.000000e+00 : f32
      %39 = vector.broadcast %cst_12 : f32 to vector<1x128xf32>
      %40 = arith.maximumf %38, %39 : vector<1x128xf32>
      %41 = math.absf %38 : vector<1x128xf32>
      %cst_13 = arith.constant 0.000000e+00 : f32
      %42 = vector.broadcast %cst_13 : f32 to vector<1x128xf32>
      %43 = arith.subf %42, %41 : vector<1x128xf32>
      %44 = math.exp %43 : vector<1x128xf32>
      %cst_14 = arith.constant 1.000000e+00 : f32
      %45 = vector.broadcast %cst_14 : f32 to vector<1x128xf32>
      %46 = arith.addf %45, %44 : vector<1x128xf32>
      %47 = math.log %46 : vector<1x128xf32>
      %48 = arith.addf %40, %47 : vector<1x128xf32>
      %c0_15 = arith.constant 0 : index
      %c0_16 = arith.constant 0 : index
      %49 = vector.load %arg6[%c0_15, %c0_16] : memref<1x128xf32, #tpu.memory_space<vmem>>, vector<1x128xf32>
      %cst_17 = arith.constant 0.000000e+00 : f32
      %50 = vector.broadcast %cst_17 : f32 to vector<1x128xf32>
      %51 = arith.select %34, %48, %50 : vector<1x128xi1>, vector<1x128xf32>
      %52 = arith.addf %49, %51 : vector<1x128xf32>
      %c0_18 = arith.constant 0 : index
      %c0_19 = arith.constant 0 : index
      %53 = vector.load %arg6[%c0_18, %c0_19] : memref<1x128xf32, #tpu.memory_space<vmem>>, vector<1x128xf32>
      tpu.vector_store %arg6[%c0_18, %c0_19], %52 {strides = array<i32>} : memref<1x128xf32, #tpu.memory_space<vmem>>, vector<1x128xf32>,
    } else {
    }
    %true = arith.constant true
    %24 = arith.xori %21, %true : i1
    %25 = arith.extui %24 : i1 to i32
    %c0_i32_7 = arith.constant 0 : i32
    %26 = arith.cmpi ne, %25, %c0_i32_7 : i32
    scf.if %26 {
      %c1_i32_10 = arith.constant 1 : i32
      %30 = arith.subi %4, %c1_i32_10 : i32
      %c128_i32 = arith.constant 128 : i32
      %31 = arith.muli %30, %c128_i32 : i32
      %32 = vector.broadcast %31 : i32 to vector<1x128xi32>
      %33 = arith.addi %20, %32 : vector<1x128xi32>
      %c16_i32 = arith.constant 16 : i32
      %34 = vector.broadcast %c16_i32 : i32 to vector<1x128xi32>
      %35 = arith.cmpi slt, %33, %34 : vector<1x128xi32>
      %c0_11 = arith.constant 0 : index
      %c0_12 = arith.constant 0 : index
      %36 = vector.load %arg7[%c0_11, %c0_12] : memref<1x128xf32, #tpu.memory_space<vmem>>, vector<1x128xf32>
      %cst_13 = arith.constant 0.000000e+00 : f32
      %37 = vector.broadcast %cst_13 : f32 to vector<1x128xf32>
      %38 = arith.select %35, %19, %37 : vector<1x128xi1>, vector<1x128xf32>
      %39 = arith.addf %36, %38 : vector<1x128xf32>
      %c0_14 = arith.constant 0 : index
      %c0_15 = arith.constant 0 : index
      %40 = vector.load %arg7[%c0_14, %c0_15] : memref<1x128xf32, #tpu.memory_space<vmem>>, vector<1x128xf32>
      tpu.vector_store %arg7[%c0_14, %c0_15], %39 {strides = array<i32>} : memref<1x128xf32, #tpu.memory_space<vmem>>, vector<1x128xf32>,
    } else {
    }
    %c1_i32_8 = arith.constant 1 : i32
    %27 = arith.cmpi eq, %arg1, %c1_i32_8 : i32
    %28 = arith.extui %27 : i1 to i32
    %c0_i32_9 = arith.constant 0 : i32
    %29 = arith.cmpi ne, %28, %c0_i32_9 : i32
    scf.if %29 {
      %c0_10 = arith.constant 0 : index
      %c0_11 = arith.constant 0 : index
      %30 = vector.load %arg6[%c0_10, %c0_11] : memref<1x128xf32, #tpu.memory_space<vmem>>, vector<1x128xf32>
      %31 = vector.shape_cast %30 : vector<1x128xf32> to vector<1x1x128xf32>
      %cst_12 = arith.constant dense<0.000000e+00> : vector<1xf32>
      %32 = vector.multi_reduction <add>, %31, %cst_12 [1, 2] : vector<1x1x128xf32> to vector<1xf32>
      %33 = vector.shape_cast %32 : vector<1xf32> to vector<1x1x1xf32>
      %34 = vector.extract %33[0, 0, 0] : f32 from vector<1x1x1xf32>
      %35 = vector.broadcast %34 : f32 to vector<1x1xf32>
      %36 = vector.shape_cast %35 : vector<1x1xf32> to vector<1x1x1xf32>
      %37 = vector.broadcast %36 : vector<1x1x1xf32> to vector<1x8x128xf32>
      %c0_13 = arith.constant 0 : index
      %c0_14 = arith.constant 0 : index
      %c0_15 = arith.constant 0 : index
      %38 = vector.load %arg4[%c0_13, %c0_14, %c0_15] : memref<1x8x128xf32, #tpu.memory_space<vmem>>, vector<1x8x128xf32>
      tpu.vector_store %arg4[%c0_13, %c0_14, %c0_15], %37 {strides = array<i32>} : memref<1x8x128xf32, #tpu.memory_space<vmem>>, vector<1x8x128xf32>,
      %c0_16 = arith.constant 0 : index
      %c0_17 = arith.constant 0 : index
      %39 = vector.load %arg7[%c0_16, %c0_17] : memref<1x128xf32, #tpu.memory_space<vmem>>, vector<1x128xf32>
      %40 = vector.shape_cast %39 : vector<1x128xf32> to vector<1x1x128xf32>
      %cst_18 = arith.constant dense<0.000000e+00> : vector<1xf32>
      %41 = vector.multi_reduction <add>, %40, %cst_18 [1, 2] : vector<1x1x128xf32> to vector<1xf32>
      %42 = vector.shape_cast %41 : vector<1xf32> to vector<1x1x1xf32>
      %43 = vector.extract %42[0, 0, 0] : f32 from vector<1x1x1xf32>
      %44 = vector.broadcast %43 : f32 to vector<1x1xf32>
      %45 = vector.shape_cast %44 : vector<1x1xf32> to vector<1x1x1xf32>
      %46 = vector.broadcast %45 : vector<1x1x1xf32> to vector<1x8x128xf32>
      %c0_19 = arith.constant 0 : index
      %c0_20 = arith.constant 0 : index
      %c0_21 = arith.constant 0 : index
      %47 = vector.load %arg5[%c0_19, %c0_20, %c0_21] : memref<1x8x128xf32, #tpu.memory_space<vmem>>, vector<1x8x128xf32>
      tpu.vector_store %arg5[%c0_19, %c0_20, %c0_21], %46 {strides = array<i32>} : memref<1x8x128xf32, #tpu.memory_space<vmem>>, vector<1x8x128xf32>,
    } else {
    }
    return
  }
  func.func @transform_0(%arg0: i32, %arg1: i32) -> (i32, i32, i32) {
    %c2_i32 = arith.constant 2 : i32
    %0 = arith.muli %arg0, %c2_i32 : i32
    %1 = arith.addi %0, %arg1 : i32
    %c0_i32 = arith.constant 0 : i32
    %c0_i32_0 = arith.constant 0 : i32
    %c0_i32_1 = arith.constant 0 : i32
    return %1, %c0_i32, %c0_i32_0 : i32, i32, i32
  }
  func.func @transform_1(%arg0: i32, %arg1: i32) -> (i32, i32) {
    %c0_i32 = arith.constant 0 : i32
    %c0_i32_0 = arith.constant 0 : i32
    %c0_i32_1 = arith.constant 0 : i32
    return %c0_i32, %c0_i32_0 : i32, i32
  }
  func.func @transform_2(%arg0: i32, %arg1: i32) -> (i32, i32, i32) {
    %c0_i32 = arith.constant 0 : i32
    %c0_i32_0 = arith.constant 0 : i32
    %c0_i32_1 = arith.constant 0 : i32
    return %arg0, %c0_i32, %c0_i32_0 : i32, i32, i32
  }
  func.func @transform_3(%arg0: i32, %arg1: i32) -> (i32, i32, i32) {
    %c0_i32 = arith.constant 0 : i32
    %c0_i32_0 = arith.constant 0 : i32
    %c0_i32_1 = arith.constant 0 : i32
    return %arg0, %c0_i32, %c0_i32_0 : i32, i32, i32
  }
}

</mosaic_0001>

<bundles_post_ra>
// kernel: tpu_custom_call.1
= control target key start
LH: loop header
LB: loop body
LE: loop exit
PB: predicated region body
PF: predicated region fallthrough
CT: control target
= control target key end

     0   :  { %9 = vsyncpa [#allocation5], 0  ;;  %s1443_s0 = inlined_call_operand.vmem [shape: s32[2,1,256], index: 0, kind: input, shape index: {}]   ;;  %s1444_s1 = inlined_call_operand.vmem [shape: f32[32,8], index: 1, kind: input, shape index: {}]   ;;  %s1445_s2 = inlined_call_operand.hbm [shape: f32[1,8,128], index: 2, kind: output, shape index: {0}]   ;;  %s1446_s3 = inlined_call_operand.hbm [shape: f32[1,8,128], index: 3, kind: output, shape index: {1}]  }
   0x1   :  { %10 = vsyncpa [#allocation7], 0  ;;  %s1234_s12 = smov 0   ;;  %s1236_s13 = smov 0  }
   0x2   :  { %s1238_s14 = smov 0  }
   0x3 LB: > { %s1010_s15 = sadd.s32 4294967295, %s1207_s14   ;;  %s25_s16 = sadd.s32 1, %s1203_s13  ;;  %s1207_s14 = sphi %s1238_s14, %s16_s14   ;;  %s1203_s13 = sphi %s1236_s13, %s1449_s13   ;;  %s1199_s12 = sphi %s1234_s12, %s1448_s12  }
   0x4   : > { %p26_p0 = scmp.ge.s32.totalorder %s25_s16, 2  ;;  %p1013_p1 = scmp.ge.s32.totalorder %s1207_s14, 1 }
   0x5   : > { %p161_p2 = scmp.lt.s32.totalorder %s1207_s14, 3 }
   0x6   : > { %s1451_s16 = smov (%p26_p0, %s25_s16), 0 }
   0x7   : > { %p162_p3 = pnand %p1013_p1, %p161_p2 }
   0x8   : > { %p183_p4 = scmp.lt.s32.totalorder (!%p162_p3), %s1199_s12, 1  ;;  %p1015_p5 = scmp.ne.s32.totalorder (!%p162_p3), %s1199_s12, 0 }
   0x9   : > { %165 = sbr.rel (%p162_p3) target bundleno = 625 (0x271), region = 28 }
  0x10   : > { %s184_s17 = scalar_select %p183_p4, %s1199_s12, 1 }
  0x11   : > { %192 = sbr.rel (%p1015_p5) target bundleno = 24 (0x18), region = 32  ;;  %v1209_v0 = vmov (!%p1015_p5), 0.0  }
  0x12   : > { %s1014_s18 = sshll.u32 %s184_s17, 1  ;;  %193 = vst [vmem:[#allocation2] sm:$0x1] (!%p1015_p5), %v1209_v0  ;;  %194 = vst [vmem:[#allocation3] sm:$0x1] (!%p1015_p5), %v1209_v0 }
  0x13   : > { %s186_s21 = scalar_lea.vmem %s1443_s0, %s1014_s18 }
  0x18 PF: > { %v202_v1 = vlaneseq  ;;  %v197_v2 = vld [vmem:[%s1444_s1] sm:$0xff]  ;;  %vm218_vm0 = vcmask 64512   ;;  %v1210_v3 = vmov 0.0   ;;  %v198_v5 = vld [vmem:[%s1444_s1 + $0x8] sm:$0xff]  ;;  %v199_v6 = vld [vmem:[%s1444_s1 + $0x10] sm:$0xff]  ;;  %v1211_v31 = vmov 1.0  }
  0x19   : > { %612 = vmatprep.mubr.f32.mxu0 %v1210_v3  ;;  %297 = vmatprep.mubr.f32.mxu1 %v1210_v3  ;;  %v220_v4 = vsel %vm218_vm0, %v197_v2, 0  ;;  %v200_v7 = vld [vmem:[%s1444_s1 + $0x18] sm:$0xff]  ;;  %v223_v11 = vsel %vm218_vm0, %v198_v5, 0  ;;  %v201_v12 = vld [vmem:[%s186_s21] sm:$0x3]  ;;  %v226_v14 = vsel %vm218_vm0, %v199_v6, 0 }
  0x1a   : > { %v1277_v8 = vshrl.u32 %v202_v1, 7  ;;  %v1279_v9 = vand.u32 127, %v202_v1  ;;  %v1281_v10 = vand.u32 4294901760, %v220_v4  ;;  %v1283_v13 = vand.u32 4294901760, %v223_v11  ;;  %p1024_p6 = scmp.ge.s32.totalorder %s1199_s12, 1 }
  0x1b   : > { %v229_v15 = vsel %vm218_vm0, %v200_v7, 0  ;;  %v1290_v19 = vand.u32 4294901760, %v226_v14  ;;  %s1025_s30 = sshll.u32 (!%p1024_p6), %s1199_s12, 7 }
  0x1c   : > { %v210_v16 = vsub.s32 1, %v1277_v8  ;;  %v206_v17 = vsub.s32 0, %v1277_v8  ;;  %v1288_v18 = vsub.f32 %v220_v4, %v1281_v10  ;;  %v1293_v20 = vsub.f32 %v223_v11, %v1283_v13 }
  0x1d   : > { %v1295_v21 = vand.u32 4294901760, %v229_v15  ;;  %v1299_v25 = vsub.f32 %v226_v14, %v1290_v19 }
  0x1e   : > { %v211_v22 = vrot.slane %v201_v12, %v210_v16  ;;  %v207_v23 = vrot.slane %v201_v12, %v206_v17  ;;  %v300_v24 = vand.u32 4294901760, %v1288_v18  ;;  %v311_v26 = vand.u32 4294901760, %v1293_v20 }
  0x1f   : > { %v1303_v27 = vsub.f32 %v229_v15, %v1295_v21  ;;  %v322_v29 = vand.u32 4294901760, %v1299_v25 }
  0x20   : > { %vm213_vm1 = vcmp.eq.s32.totalorder %v1277_v8, %v211_v22  ;;  %vm212_vm2 = vcmp.eq.s32.totalorder %v1277_v8, %v207_v23  ;;  %v301_v28 = vsub.f32 %v1288_v18, %v300_v24  ;;  %v312_v33 = vsub.f32 %v1293_v20, %v311_v26 }
  0x21   : > { %v1017_v30 = vsel %vm213_vm1, 1.0, %v1210_v3  ;;  %1020 = vmatprep.subr.msk.mxu0 %vm213_vm1, %v1211_v31  ;;  %1018 = vmatprep.subr.msk.mxu1 %vm213_vm1, %v1211_v31  ;;  %v1016_v32 = vsel %vm212_vm2, 1.0, %v1210_v3  ;;  %v333_v37 = vand.u32 4294901760, %v1303_v27  ;;  %v323_v41 = vsub.f32 %v1299_v25, %v322_v29 }
  0x22   : > { %v343_v34 = vsub.f32 %v1017_v30, %v1017_v30  ;;  %v349_v35 = vsub.f32 %v1016_v32, %v1016_v32  ;;  %1021 = vmatpush1.msk.msra.mxu0 %vm212_vm2, %v1211_v31  ;;  %1019 = vmatpush1.msk.msra.mxu1 %vm212_vm2, %v1211_v31  ;;  %v302_v36 = vand.u32 4294901760, %v301_v28  ;;  %v313_v38 = vand.u32 4294901760, %v312_v33 }
  0x23   : > { %616 = vmatmul.mubr.f32.vlgmr.msra.gmra.mrb[0].mxu0 %v300_v24  ;;  %v324_v46 = vand.u32 4294901760, %v323_v41  ;;  %v334_v47 = vsub.f32 %v1303_v27, %v333_v37  ;;  %v863_v30 = vstv (!%p1024_p6), %s1025_s30 }
  0x24   : > { %303 = vmatmul.mubr.f32.vlgmr.msra.gmra.mrb[0].mxu1 %v302_v36  ;;  %621 = vmatprep.mubr.f32.mxu0 %v1210_v3  ;;  %v344_v39 = vand.u32 4294901760, %v343_v34  ;;  %v350_v40 = vand.u32 4294901760, %v349_v35  ;;  %v877_v36 = vld [vmem:[#allocation2] sm:$0x1] (!%p1024_p6) }
  0x25   : > { %308 = vmatprep.mubr.f32.mxu1 %v1210_v3  ;;  %v335_v48 = vand.u32 4294901760, %v334_v47 }
  0x26   : > { %v345_v42 = vsub.f32 %v343_v34, %v344_v39  ;;  %652 = vmatprep.subr.mxu0 %v344_v39  ;;  %v351_v43 = vsub.f32 %v349_v35, %v350_v40 }
  0x27   : > { %625 = vmatmul.mubr.f32.gmra.mrb[2].mxu0 %v311_v26 }
  0x28   : > { %314 = vmatmul.mubr.f32.gmra.mrb[2].mxu1 %v313_v38  ;;  %v346_v44 = vand.u32 4294901760, %v345_v42  ;;  %630 = vmatprep.mubr.f32.mxu0 %v1210_v3  ;;  %v352_v45 = vand.u32 4294901760, %v351_v43 }
  0x29   : > { %319 = vmatprep.mubr.f32.mxu1 %v1210_v3  ;;  %656 = vmatpush1.msra.mxu0 %v350_v40 }
  0x2a   : > { %347 = vmatprep.subr.mxu1 %v346_v44  ;;  %1022 = vmatprep.subr.msk.mxu0 %vm213_vm1, %v1211_v31 }
  0x2b   : > { %353 = vmatpush1.msra.mxu1 %v352_v45  ;;  %634 = vmatmul.mubr.f32.gmra.mrb[4].mxu0 %v322_v29 }
  0x2c   : > { %325 = vmatmul.mubr.f32.gmra.mrb[4].mxu1 %v324_v46  ;;  %639 = vmatprep.mubr.f32.mxu0 %v1210_v3 }
  0x2d   : > { %330 = vmatprep.mubr.f32.mxu1 %v1210_v3  ;;  %447 = vmatprep.subr.mxu1 %v343_v34 }
  0x2f   : > { %643 = vmatmul.mubr.f32.gmra.mrb[6].mxu0 %v333_v37 }
  0x30   : > { %336 = vmatmul.mubr.f32.gmra.mrb[6].mxu1 %v335_v48  ;;  %719 = vmatprep.mubr.f32.mxu0 %v1210_v3 }
  0x31   : > { %416 = vmatprep.mubr.f32.mxu1 %v1210_v3 }
  0x33   : > { %721 = vmatmul.mubr.f32.vlgmr.msra.gmra.mrb[0].mxu0 %v1281_v10 }
  0x34   : > { %418 = vmatmul.mubr.f32.vlgmr.msra.gmra.mrb[0].mxu1 %v1281_v10  ;;  %726 = vmatprep.mubr.f32.mxu0 %v1210_v3 }
  0x35   : > { %423 = vmatprep.mubr.f32.mxu1 %v1210_v3  ;;  %450 = vmatpush1.msra.mxu1 %v349_v35 }
  0x36   : > { %1023 = vmatpush1.msk.msra.mxu0 %vm212_vm2, %v1211_v31  ;;  %v864_v31 = vadd.s32 (!%p1024_p6), %v863_v30, %v1279_v9 }
  0x37   : > { %728 = vmatmul.mubr.f32.gmra.mrb[2].mxu0 %v1283_v13 }
  0x38   : > { %425 = vmatmul.mubr.f32.gmra.mrb[2].mxu1 %v1283_v13  ;;  %733 = vmatprep.mubr.f32.mxu0 %v1210_v3  ;;  %vm865_vm3 = vcmp.lt.s32.totalorder (!%p1024_p6), %v864_v31, 16 }
  0x39   : > { %430 = vmatprep.mubr.f32.mxu1 %v1210_v3 }
  0x3b   : > { %735 = vmatmul.mubr.f32.gmra.mrb[4].mxu0 %v1290_v19 }
  0x3c   : > { %432 = vmatmul.mubr.f32.gmra.mrb[4].mxu1 %v1290_v19  ;;  %740 = vmatprep.mubr.f32.mxu0 %v1210_v3 }
  0x3d   : > { %437 = vmatprep.mubr.f32.mxu1 %v1210_v3 }
  0x3f   : > { %742 = vmatmul.mubr.f32.gmra.mrb[6].mxu0 %v1295_v21 }
  0x40   : > { %439 = vmatmul.mubr.f32.gmra.mrb[6].mxu1 %v1295_v21  ;;  %814 = vmatprep.mubr.f32.mxu0 %v1210_v3 }
  0x41   : > { %513 = vmatprep.mubr.f32.mxu1 %v1210_v3 }
  0x43   : > { %816 = vmatmul.mubr.f32.vlgmr.msra.gmra.mrb[0].mxu0 %v1281_v10 }
  0x44   : > { %516 = vmatmul.mubr.f32.vlgmr.msra.gmra.mrb[0].mxu1 %v1288_v18  ;;  %821 = vmatprep.mubr.f32.mxu0 %v1210_v3 }
  0x45   : > { %521 = vmatprep.mubr.f32.mxu1 %v1210_v3 }
  0x47   : > { %823 = vmatmul.mubr.f32.gmra.mrb[2].mxu0 %v1283_v13 }
  0x48   : > { %524 = vmatmul.mubr.f32.gmra.mrb[2].mxu1 %v1293_v20  ;;  %828 = vmatprep.mubr.f32.mxu0 %v1210_v3 }
  0x49   : > { %529 = vmatprep.mubr.f32.mxu1 %v1210_v3 }
  0x4b   : > { %830 = vmatmul.mubr.f32.gmra.mrb[4].mxu0 %v1290_v19 }
  0x4c   : > { %532 = vmatmul.mubr.f32.gmra.mrb[4].mxu1 %v1299_v25  ;;  %835 = vmatprep.mubr.f32.mxu0 %v1210_v3 }
  0x4d   : > { %537 = vmatprep.mubr.f32.mxu1 %v1210_v3 }
  0x4f   : > { %837 = vmatmul.mubr.f32.gmra.mrb[6].mxu0 %v1295_v21 }
  0x50   : > { %540 = vmatmul.mubr.f32.gmra.mrb[6].mxu1 %v1303_v27 }
 0x116   : > { %v817_v49 = vpop.f32.mrb[0].mxu0 }
 0x117   : > { %v517_v50 = vpop.f32.mrb[0].mxu1  ;;  %v819_v51 = vpop.f32.mrb[1].mxu0 }
 0x118   : > { %v1036_v52 = vadd.f32 %v817_v49, %v517_v50  ;;  %v519_v53 = vpop.f32.mrb[1].mxu1 }
 0x119   : > { %v1037_v54 = vadd.f32 %v819_v51, %v519_v53 }
 0x11a   : > { %v824_v55 = vpop.f32.mrb[2].mxu0 }
 0x11b   : > { %v843_v56 = vmul.f32 %v1037_v54, %v1036_v52  ;;  %v525_v57 = vpop.f32.mrb[2].mxu1  ;;  %v826_v58 = vpop.f32.mrb[3].mxu0 }
 0x11c   : > { %v1038_v59 = vadd.f32 %v824_v55, %v525_v57  ;;  %v527_v60 = vpop.f32.mrb[3].mxu1 }
 0x11d   : > { %v1039_v61 = vadd.f32 %v826_v58, %v527_v60 }
 0x11e   : > { %v831_v62 = vpop.f32.mrb[4].mxu0 }
 0x11f   : > { %v844_v63 = vmul.f32 %v1039_v61, %v1038_v59  ;;  %v533_v0 = vpop.f32.mrb[4].mxu1  ;;  %v833_v1 = vpop.f32.mrb[5].mxu0 }
 0x120   : > { %v1040_v2 = vadd.f32 %v831_v62, %v533_v0  ;;  %v535_v3 = vpop.f32.mrb[5].mxu1 }
 0x121   : > { %v847_v4 = vadd.f32 %v844_v63, %v843_v56  ;;  %v1041_v5 = vadd.f32 %v833_v1, %v535_v3 }
 0x122   : > { %v838_v6 = vpop.f32.mrb[6].mxu0 }
 0x123   : > { %v845_v7 = vmul.f32 %v1041_v5, %v1040_v2  ;;  %v541_v8 = vpop.f32.mrb[6].mxu1  ;;  %v840_v10 = vpop.f32.mrb[7].mxu0 }
 0x124   : > { %v1042_v11 = vadd.f32 %v838_v6, %v541_v8  ;;  %v543_v12 = vpop.f32.mrb[7].mxu1 }
 0x125   : > { %v848_v13 = vadd.f32 %v847_v4, %v845_v7  ;;  %v1043_v14 = vadd.f32 %v840_v10, %v543_v12 }
 0x127   : > { %v846_v15 = vmul.f32 %v1043_v14, %v1042_v11 }
 0x129   : > { %v849_v16 = vadd.f32 %v848_v13, %v846_v15 }
 0x12b   : > { %v850_v17 = vrot.slane %v849_v16, 4 }
 0x12d   : > { %v851_v18 = vadd.f32 %v850_v17, %v849_v16 }
 0x12f   : > { %v852_v19 = vrot.slane %v851_v18, 2  ;;  %861 = sbr.rel (%p1024_p6) target bundleno = 353 (0x161), region = 36 }
 0x131   : > { %v853_v20 = vadd.f32 %v852_v19, %v851_v18 }
 0x133   : > { %v854_v21 = vrot.slane %v853_v20, 1 }
 0x135   : > { %v855_v22 = vadd.f32 %v854_v21, %v853_v20 }
 0x137   : > { %v866_v23 = vadd.f32 0.84729785, %v855_v22 }
 0x139   : > { %v867_v24 = vsub.f32 0.0, %v866_v23 }
 0x13b   : > { %v869_v25 = vand.u32 2147483647, %v867_v24  ;;  %v868_v32 = vmax.f32 %v867_v24, 0.0 }
 0x13d   : > { %v870_v26 = vsub.f32 0.0, %v869_v25 }
 0x13f   : > { %v871_v27 = vmul.f32 1.442695, %v870_v26 }
 0x141   : > { %1121 = vpow2.f32 %v871_v27 }
 0x14b   : > { %v1122_v28 = vpop.eup %1121 }
 0x14c   : > { %v873_v29 = vadd.f32 1.0, %v1122_v28 }
 0x14e   : > { %1123 = vlog2.f32 %v873_v29 }
 0x158   : > { %v1124_v33 = vpop.eup %1123 }
 0x159   : > { %v875_v34 = vmul.f32 0.6931472, %v1124_v33 }
 0x15b   : > { %v876_v35 = vadd.f32 %v875_v34, %v868_v32 }
 0x15d   : > { %v878_v37 = vsel %vm865_vm3, %v876_v35, 0.0 }
 0x15e   : > { %v879_v38 = vadd.f32 %v878_v37, %v877_v36 }
 0x160   : > { %880 = vst [vmem:[#allocation2] sm:$0x1] %v879_v38 }
 0x161 PF: > { %884 = sbr.rel (%p183_p4) target bundleno = 363 (0x16b), region = 40  ;;  %s1027_s4 = sadd.s32 (!%p183_p4), 4294967295, %s1199_s12  ;;  %v890_v41 = vld [vmem:[#allocation3] sm:$0x1] (!%p183_p4) }
 0x162   : > { %s1028_s5 = sshll.u32 (!%p183_p4), %s1027_s4, 7 }
 0x163   : > { %v887_v39 = vstv (!%p183_p4), %s1028_s5 }
 0x164   : > { %v888_v40 = vadd.s32 (!%p183_p4), %v887_v39, %v1279_v9 }
 0x166   : > { %vm889_vm4 = vcmp.lt.s32.totalorder (!%p183_p4), %v888_v40, 16 }
 0x167   : > { %v891_v42 = vsel (!%p183_p4), %vm889_vm4, %v855_v22, 0.0 }
 0x168   : > { %v892_v43 = vadd.f32 %v891_v42, %v890_v41 }
 0x16a   : > { %893 = vst [vmem:[#allocation3] sm:$0x1] %v892_v43 }
 0x16b PF: > { %p1029_p7 = scmp.ne.s32.totalorder %s1199_s12, 1 }
 0x16c   : > { %v898_v44 = vld [vmem:[#allocation2] sm:$0x1] (!%p1029_p7)  ;;  %vm899_vm5 = vcmask (!%p1029_p7), 1040384  }
 0x16d   : > { %897 = sbr.rel (%p1029_p7) target bundleno = 577 (0x241), region = 44  ;;  %v900_v46 = vsel (!%p1029_p7), %vm899_vm5, %v898_v44, 0.0 }
 0x16e   : > { %901 = vadd.xlane.f32.xlu0 (!%p1029_p7), %v900_v46 }
 0x171   : > { %v912_v45 = vld [vmem:[#allocation3] sm:$0x1] (!%p1029_p7) }
 0x172   : > { %v913_v47 = vsel (!%p1029_p7), %vm899_vm5, %v912_v45, 0.0 }
 0x173   : > { %914 = vadd.xlane.f32.xlu0 (!%p1029_p7), %v913_v47 }
 0x1fb   : > { %v902_v48 = vpop.xlane.xlu0 %901 }
 0x1fc   : > { %v903_v49 = vrot.slane %v902_v48, 4 }
 0x1fe   : > { %v904_v50 = vadd.f32 %v903_v49, %v902_v48 }
 0x200   : > { %v915_v9 = vpop.xlane.xlu0 %914  ;;  %v905_v51 = vrot.slane %v904_v50, 2 }
 0x201   : > { %v916_v52 = vrot.slane %v915_v9, 4 }
 0x202   : > { %v906_v54 = vadd.f32 %v905_v51, %v904_v50 }
 0x203   : > { %v917_v53 = vadd.f32 %v916_v52, %v915_v9 }
 0x204   : > { %v907_v56 = vrot.slane %v906_v54, 1 }
 0x205   : > { %v918_v55 = vrot.slane %v917_v53, 2 }
 0x206   : > { %v908_v58 = vadd.f32 %v907_v56, %v906_v54 }
 0x207   : > { %v919_v57 = vadd.f32 %v918_v55, %v917_v53 }
 0x208   : > { %1076 = vpush %v908_v58 }
 0x209   : > { %v920_v59 = vrot.slane %v919_v57, 1 }
 0x20b   : > { %v921_v60 = vadd.f32 %v920_v59, %v919_v57 }
 0x20d   : > { %1078 = vpush %v921_v60 }
 0x239   : > { %s1077_s6 = spop %1076 }
 0x23a   : > { %v910_v61 = vstv %s1077_s6 }
 0x23b   : > { %911 = vst [vmem:[#allocation4] sm:$0xff] %v910_v61 }
 0x23e   : > { %s1079_s7 = spop %1078 }
 0x23f   : > { %v923_v62 = vstv %s1079_s7 }
 0x240   : > { %924 = vst [vmem:[#allocation6] sm:$0xff] %v923_v62 }
 0x241 PF: > { %p1379_p8 = scmp.eq.s32.totalorder %s1010_s15, 1  ;;  %s1212_s9 = smov [#allocation4]  }
 0x242   : > { %s934_s10 = sshll.u32 %s1212_s9, 4  ;;  %s1213_s11 = smov [#allocation6]   ;;  %s935_s10 = int_to_ptr.vmem [resolvable:$true] %s934_s10 }
 0x243   : > { %s947_s12 = sshll.u32 %s1213_s11, 4  ;;  %s1125_s17 = scalar_lea.vmem %s935_s10, 128  ;;  %s1383_s12 = int_to_ptr.vmem [resolvable:$true] %s947_s12 }
 0x244   : > { %p1126_p9 = scmp.ne.s32.totalorder %s935_s10, %s1125_s17  ;;  %p1132_p12 = scmp.lt.s32.totalorder %s935_s10, %s935_s10 }
 0x245   : > { %p1133_p13 = scmp.lt.s32.totalorder %s1125_s17, %s1125_s17 }
 0x246   : > { %p1127_p10 = pnand %p1126_p9, %p1379_p8 }
 0x247   : > { %p1134_p0 = por %p1133_p13, %p1132_p12 }
 0x248   : > { %p1128_p11 = pneg %p1127_p10 }
 0x24a   : > { %p1135_p1 = pnand %p1134_p0, %p1128_p11 }
 0x24c   : > { %1138 = shalt.err (!%p1135_p1)
}
 0x24d   : > { %s1139_s19 = scalar_lea.hbm %s1445_s2, 128 }
 0x24e   : > { %p1140_p2 = scmp.ne.s32.totalorder %s1445_s2, %s1139_s19  ;;  %p1145_p5 = scmp.lt.u32.totalorder %s1139_s19, %s1445_s2 }
 0x250   : > { %p1141_p3 = pnand %p1140_p2, %p1379_p8 }
 0x252   : > { %p1142_p4 = pneg %p1141_p3 }
 0x254   : > { %p1147_p6 = pnand %p1145_p5, %p1142_p4 }
 0x256   : > { %1150 = shalt.err (!%p1147_p6)
}
 0x257   : > { %1081 = dma.vmem_to_hbm [thread:$0]  (%p1379_p8), %s935_s10, 128, %s1445_s2, [#allocation5]  }
 0x258   : > { %s1151_s26 = scalar_lea.vmem %s1383_s12, 128  ;;  %p1158_p11 = scmp.lt.s32.totalorder %s1383_s12, %s1383_s12 }
 0x259   : > { %p1152_p7 = scmp.ne.s32.totalorder %s1383_s12, %s1151_s26  ;;  %p1159_p12 = scmp.lt.s32.totalorder %s1151_s26, %s1151_s26 }
 0x25b   : > { %p1153_p9 = pnand %p1152_p7, %p1379_p8  ;;  %p1160_p13 = por %p1159_p12, %p1158_p11 }
 0x25d   : > { %p1154_p10 = pneg %p1153_p9 }
 0x25f   : > { %p1161_p0 = pnand %p1160_p13, %p1154_p10 }
 0x261   : > { %1164 = shalt.err (!%p1161_p0)
}
 0x262   : > { %s1165_s29 = scalar_lea.hbm %s1446_s3, 128 }
 0x263   : > { %p1166_p1 = scmp.ne.s32.totalorder %s1446_s3, %s1165_s29  ;;  %p1171_p4 = scmp.lt.u32.totalorder %s1165_s29, %s1446_s3 }
 0x265   : > { %p1167_p2 = pnand %p1166_p1, %p1379_p8 }
 0x267   : > { %p1168_p3 = pneg %p1167_p2 }
 0x269   : > { %p1173_p5 = pnand %p1171_p4, %p1168_p3 }
 0x26b   : > { %1176 = shalt.err (!%p1173_p5)
}
 0x26c   : > { %1083 = dma.vmem_to_hbm [thread:$0]  (%p1379_p8), %s1383_s12, 128, %s1446_s3, [#allocation7]  }
 0x26d   : > { %1190 = dma.done.wait (%p1379_p8), [#allocation5], 128  }
 0x26e   : > { %1192 = vsyncadd (%p1379_p8), [#allocation5], 4294967168 }
 0x26f   : > { %1194 = dma.done.wait (%p1379_p8), [#allocation7], 128  }
 0x270   : > { %1196 = vsyncadd (%p1379_p8), [#allocation7], 4294967168 }
 0x271 PF: > { %s16_s14 = sadd.s32 1, %s1207_s14   ;;  %s1448_s12 = smov %s1203_s13 }
 0x272   : > { %p13_p6 = scmp.ge.s32.totalorder %s16_s14, 4   ;;  %s1449_s13 = smov %s1451_s16 }
 0x274   :  { %15 = sbr.rel (!%p13_p6) target bundleno = 3 (0x3), region = 81 }
 0x27b   :  { %964 = vsyncpa [#allocation5], 1 }
 0x27c   :  { %966 = vsyncpa [#allocation5 + $0x1], 1 }
 0x27d   :  { %967 = vsyncpa [#allocation7], 1 }

// kernel: tpu_custom_call.1
= control target key start
LH: loop header
LB: loop body
LE: loop exit
PB: predicated region body
PF: predicated region fallthrough
CT: control target
= control target key end

     0   :  { %9 = vsyncpa [#allocation5], 0  ;;  %s1443_s0 = inlined_call_operand.vmem [shape: s32[2,1,256], index: 0, kind: input, shape index: {}]   ;;  %s1444_s1 = inlined_call_operand.vmem [shape: f32[32,8], index: 1, kind: input, shape index: {}]   ;;  %s1445_s2 = inlined_call_operand.hbm [shape: f32[1,8,128], index: 2, kind: output, shape index: {0}]   ;;  %s1446_s3 = inlined_call_operand.hbm [shape: f32[1,8,128], index: 3, kind: output, shape index: {1}]  }
   0x1   :  { %10 = vsyncpa [#allocation7], 0  ;;  %s1234_s12 = smov 0   ;;  %s1236_s13 = smov 0  }
   0x2   :  { %s1238_s14 = smov 0  }
   0x3 LB: > { %s1010_s15 = sadd.s32 4294967295, %s1207_s14   ;;  %s25_s16 = sadd.s32 1, %s1203_s13  ;;  %s1207_s14 = sphi %s1238_s14, %s16_s14   ;;  %s1203_s13 = sphi %s1236_s13, %s1449_s13   ;;  %s1199_s12 = sphi %s1234_s12, %s1448_s12  }
   0x4   : > { %p26_p0 = scmp.ge.s32.totalorder %s25_s16, 2  ;;  %p1013_p1 = scmp.ge.s32.totalorder %s1207_s14, 1 }
   0x5   : > { %p161_p2 = scmp.lt.s32.totalorder %s1207_s14, 3 }
   0x6   : > { %s1451_s16 = smov (%p26_p0, %s25_s16), 0 }
   0x7   : > { %p162_p3 = pnand %p1013_p1, %p161_p2 }
   0x8   : > { %p183_p4 = scmp.lt.s32.totalorder (!%p162_p3), %s1199_s12, 1  ;;  %p1015_p5 = scmp.ne.s32.totalorder (!%p162_p3), %s1199_s12, 0 }
   0x9   : > { %165 = sbr.rel (%p162_p3) target bundleno = 625 (0x271), region = 28 }
  0x10   : > { %s184_s17 = scalar_select %p183_p4, %s1199_s12, 1 }
  0x11   : > { %192 = sbr.rel (%p1015_p5) target bundleno = 24 (0x18), region = 32  ;;  %v1209_v0 = vmov (!%p1015_p5), 0.0  }
  0x12   : > { %s1014_s18 = sshll.u32 %s184_s17, 1  ;;  %193 = vst [vmem:[#allocation2] sm:$0x1] (!%p1015_p5), %v1209_v0  ;;  %194 = vst [vmem:[#allocation3] sm:$0x1] (!%p1015_p5), %v1209_v0 }
  0x13   : > { %s186_s21 = scalar_lea.vmem %s1443_s0, %s1014_s18 }
  0x18 PF: > { %v202_v1 = vlaneseq  ;;  %v197_v2 = vld [vmem:[%s1444_s1] sm:$0xff]  ;;  %vm218_vm0 = vcmask 64512   ;;  %v1210_v3 = vmov 0.0   ;;  %v198_v5 = vld [vmem:[%s1444_s1 + $0x8] sm:$0xff]  ;;  %v199_v6 = vld [vmem:[%s1444_s1 + $0x10] sm:$0xff]  ;;  %v1211_v31 = vmov 1.0  }
  0x19   : > { %612 = vmatprep.mubr.f32.mxu0 %v1210_v3  ;;  %297 = vmatprep.mubr.f32.mxu1 %v1210_v3  ;;  %v220_v4 = vsel %vm218_vm0, %v197_v2, 0  ;;  %v200_v7 = vld [vmem:[%s1444_s1 + $0x18] sm:$0xff]  ;;  %v223_v11 = vsel %vm218_vm0, %v198_v5, 0  ;;  %v201_v12 = vld [vmem:[%s186_s21] sm:$0x3]  ;;  %v226_v14 = vsel %vm218_vm0, %v199_v6, 0 }
  0x1a   : > { %v1277_v8 = vshrl.u32 %v202_v1, 7  ;;  %v1279_v9 = vand.u32 127, %v202_v1  ;;  %v1281_v10 = vand.u32 4294901760, %v220_v4  ;;  %v1283_v13 = vand.u32 4294901760, %v223_v11  ;;  %p1024_p6 = scmp.ge.s32.totalorder %s1199_s12, 1 }
  0x1b   : > { %v229_v15 = vsel %vm218_vm0, %v200_v7, 0  ;;  %v1290_v19 = vand.u32 4294901760, %v226_v14  ;;  %s1025_s30 = sshll.u32 (!%p1024_p6), %s1199_s12, 7 }
  0x1c   : > { %v210_v16 = vsub.s32 1, %v1277_v8  ;;  %v206_v17 = vsub.s32 0, %v1277_v8  ;;  %v1288_v18 = vsub.f32 %v220_v4, %v1281_v10  ;;  %v1293_v20 = vsub.f32 %v223_v11, %v1283_v13 }
  0x1d   : > { %v1295_v21 = vand.u32 4294901760, %v229_v15  ;;  %v1299_v25 = vsub.f32 %v226_v14, %v1290_v19 }
  0x1e   : > { %v211_v22 = vrot.slane %v201_v12, %v210_v16  ;;  %v207_v23 = vrot.slane %v201_v12, %v206_v17  ;;  %v300_v24 = vand.u32 4294901760, %v1288_v18  ;;  %v311_v26 = vand.u32 4294901760, %v1293_v20 }
  0x1f   : > { %v1303_v27 = vsub.f32 %v229_v15, %v1295_v21  ;;  %v322_v29 = vand.u32 4294901760, %v1299_v25 }
  0x20   : > { %vm213_vm1 = vcmp.eq.s32.totalorder %v1277_v8, %v211_v22  ;;  %vm212_vm2 = vcmp.eq.s32.totalorder %v1277_v8, %v207_v23  ;;  %v301_v28 = vsub.f32 %v1288_v18, %v300_v24  ;;  %v312_v33 = vsub.f32 %v1293_v20, %v311_v26 }
  0x21   : > { %v1017_v30 = vsel %vm213_vm1, 1.0, %v1210_v3  ;;  %1020 = vmatprep.subr.msk.mxu0 %vm213_vm1, %v1211_v31  ;;  %1018 = vmatprep.subr.msk.mxu1 %vm213_vm1, %v1211_v31  ;;  %v1016_v32 = vsel %vm212_vm2, 1.0, %v1210_v3  ;;  %v333_v37 = vand.u32 4294901760, %v1303_v27  ;;  %v323_v41 = vsub.f32 %v1299_v25, %v322_v29 }
  0x22   : > { %v343_v34 = vsub.f32 %v1017_v30, %v1017_v30  ;;  %v349_v35 = vsub.f32 %v1016_v32, %v1016_v32  ;;  %1021 = vmatpush1.msk.msra.mxu0 %vm212_vm2, %v1211_v31  ;;  %1019 = vmatpush1.msk.msra.mxu1 %vm212_vm2, %v1211_v31  ;;  %v302_v36 = vand.u32 4294901760, %v301_v28  ;;  %v313_v38 = vand.u32 4294901760, %v312_v33 }
  0x23   : > { %616 = vmatmul.mubr.f32.vlgmr.msra.gmra.mrb[0].mxu0 %v300_v24  ;;  %v324_v46 = vand.u32 4294901760, %v323_v41  ;;  %v334_v47 = vsub.f32 %v1303_v27, %v333_v37  ;;  %v863_v30 = vstv (!%p1024_p6), %s1025_s30 }
  0x24   : > { %303 = vmatmul.mubr.f32.vlgmr.msra.gmra.mrb[0].mxu1 %v302_v36  ;;  %621 = vmatprep.mubr.f32.mxu0 %v1210_v3  ;;  %v344_v39 = vand.u32 4294901760, %v343_v34  ;;  %v350_v40 = vand.u32 4294901760, %v349_v35  ;;  %v877_v36 = vld [vmem:[#allocation2] sm:$0x1] (!%p1024_p6) }
  0x25   : > { %308 = vmatprep.mubr.f32.mxu1 %v1210_v3  ;;  %v335_v48 = vand.u32 4294901760, %v334_v47 }
  0x26   : > { %v345_v42 = vsub.f32 %v343_v34, %v344_v39  ;;  %652 = vmatprep.subr.mxu0 %v344_v39  ;;  %v351_v43 = vsub.f32 %v349_v35, %v350_v40 }
  0x27   : > { %625 = vmatmul.mubr.f32.gmra.mrb[2].mxu0 %v311_v26 }
  0x28   : > { %314 = vmatmul.mubr.f32.gmra.mrb[2].mxu1 %v313_v38  ;;  %v346_v44 = vand.u32 4294901760, %v345_v42  ;;  %630 = vmatprep.mubr.f32.mxu0 %v1210_v3  ;;  %v352_v45 = vand.u32 4294901760, %v351_v43 }
  0x29   : > { %319 = vmatprep.mubr.f32.mxu1 %v1210_v3  ;;  %656 = vmatpush1.msra.mxu0 %v350_v40 }
  0x2a   : > { %347 = vmatprep.subr.mxu1 %v346_v44  ;;  %1022 = vmatprep.subr.msk.mxu0 %vm213_vm1, %v1211_v31 }
  0x2b   : > { %353 = vmatpush1.msra.mxu1 %v352_v45  ;;  %634 = vmatmul.mubr.f32.gmra.mrb[4].mxu0 %v322_v29 }
  0x2c   : > { %325 = vmatmul.mubr.f32.gmra.mrb[4].mxu1 %v324_v46  ;;  %639 = vmatprep.mubr.f32.mxu0 %v1210_v3 }
  0x2d   : > { %330 = vmatprep.mubr.f32.mxu1 %v1210_v3  ;;  %447 = vmatprep.subr.mxu1 %v343_v34 }
  0x2f   : > { %643 = vmatmul.mubr.f32.gmra.mrb[6].mxu0 %v333_v37 }
  0x30   : > { %336 = vmatmul.mubr.f32.gmra.mrb[6].mxu1 %v335_v48  ;;  %719 = vmatprep.mubr.f32.mxu0 %v1210_v3 }
  0x31   : > { %416 = vmatprep.mubr.f32.mxu1 %v1210_v3 }
  0x33   : > { %721 = vmatmul.mubr.f32.vlgmr.msra.gmra.mrb[0].mxu0 %v1281_v10 }
  0x34   : > { %418 = vmatmul.mubr.f32.vlgmr.msra.gmra.mrb[0].mxu1 %v1281_v10  ;;  %726 = vmatprep.mubr.f32.mxu0 %v1210_v3 }
  0x35   : > { %423 = vmatprep.mubr.f32.mxu1 %v1210_v3  ;;  %450 = vmatpush1.msra.mxu1 %v349_v35 }
  0x36   : > { %1023 = vmatpush1.msk.msra.mxu0 %vm212_vm2, %v1211_v31  ;;  %v864_v31 = vadd.s32 (!%p1024_p6), %v863_v30, %v1279_v9 }
  0x37   : > { %728 = vmatmul.mubr.f32.gmra.mrb[2].mxu0 %v1283_v13 }
  0x38   : > { %425 = vmatmul.mubr.f32.gmra.mrb[2].mxu1 %v1283_v13  ;;  %733 = vmatprep.mubr.f32.mxu0 %v1210_v3  ;;  %vm865_vm3 = vcmp.lt.s32.totalorder (!%p1024_p6), %v864_v31, 16 }
  0x39   : > { %430 = vmatprep.mubr.f32.mxu1 %v1210_v3 }
  0x3b   : > { %735 = vmatmul.mubr.f32.gmra.mrb[4].mxu0 %v1290_v19 }
  0x3c   : > { %432 = vmatmul.mubr.f32.gmra.mrb[4].mxu1 %v1290_v19  ;;  %740 = vmatprep.mubr.f32.mxu0 %v1210_v3 }
  0x3d   : > { %437 = vmatprep.mubr.f32.mxu1 %v1210_v3 }
  0x3f   : > { %742 = vmatmul.mubr.f32.gmra.mrb[6].mxu0 %v1295_v21 }
  0x40   : > { %439 = vmatmul.mubr.f32.gmra.mrb[6].mxu1 %v1295_v21  ;;  %814 = vmatprep.mubr.f32.mxu0 %v1210_v3 }
  0x41   : > { %513 = vmatprep.mubr.f32.mxu1 %v1210_v3 }
  0x43   : > { %816 = vmatmul.mubr.f32.vlgmr.msra.gmra.mrb[0].mxu0 %v1281_v10 }
  0x44   : > { %516 = vmatmul.mubr.f32.vlgmr.msra.gmra.mrb[0].mxu1 %v1288_v18  ;;  %821 = vmatprep.mubr.f32.mxu0 %v1210_v3 }
  0x45   : > { %521 = vmatprep.mubr.f32.mxu1 %v1210_v3 }
  0x47   : > { %823 = vmatmul.mubr.f32.gmra.mrb[2].mxu0 %v1283_v13 }
  0x48   : > { %524 = vmatmul.mubr.f32.gmra.mrb[2].mxu1 %v1293_v20  ;;  %828 = vmatprep.mubr.f32.mxu0 %v1210_v3 }
  0x49   : > { %529 = vmatprep.mubr.f32.mxu1 %v1210_v3 }
  0x4b   : > { %830 = vmatmul.mubr.f32.gmra.mrb[4].mxu0 %v1290_v19 }
  0x4c   : > { %532 = vmatmul.mubr.f32.gmra.mrb[4].mxu1 %v1299_v25  ;;  %835 = vmatprep.mubr.f32.mxu0 %v1210_v3 }
  0x4d   : > { %537 = vmatprep.mubr.f32.mxu1 %v1210_v3 }
  0x4f   : > { %837 = vmatmul.mubr.f32.gmra.mrb[6].mxu0 %v1295_v21 }
  0x50   : > { %540 = vmatmul.mubr.f32.gmra.mrb[6].mxu1 %v1303_v27 }
 0x116   : > { %v817_v49 = vpop.f32.mrb[0].mxu0 }
 0x117   : > { %v517_v50 = vpop.f32.mrb[0].mxu1  ;;  %v819_v51 = vpop.f32.mrb[1].mxu0 }
 0x118   : > { %v1036_v52 = vadd.f32 %v817_v49, %v517_v50  ;;  %v519_v53 = vpop.f32.mrb[1].mxu1 }
 0x119   : > { %v1037_v54 = vadd.f32 %v819_v51, %v519_v53 }
 0x11a   : > { %v824_v55 = vpop.f32.mrb[2].mxu0 }
 0x11b   : > { %v843_v56 = vmul.f32 %v1037_v54, %v1036_v52  ;;  %v525_v57 = vpop.f32.mrb[2].mxu1  ;;  %v826_v58 = vpop.f32.mrb[3].mxu0 }
 0x11c   : > { %v1038_v59 = vadd.f32 %v824_v55, %v525_v57  ;;  %v527_v60 = vpop.f32.mrb[3].mxu1 }
 0x11d   : > { %v1039_v61 = vadd.f32 %v826_v58, %v527_v60 }
 0x11e   : > { %v831_v62 = vpop.f32.mrb[4].mxu0 }
 0x11f   : > { %v844_v63 = vmul.f32 %v1039_v61, %v1038_v59  ;;  %v533_v0 = vpop.f32.mrb[4].mxu1  ;;  %v833_v1 = vpop.f32.mrb[5].mxu0 }
 0x120   : > { %v1040_v2 = vadd.f32 %v831_v62, %v533_v0  ;;  %v535_v3 = vpop.f32.mrb[5].mxu1 }
 0x121   : > { %v847_v4 = vadd.f32 %v844_v63, %v843_v56  ;;  %v1041_v5 = vadd.f32 %v833_v1, %v535_v3 }
 0x122   : > { %v838_v6 = vpop.f32.mrb[6].mxu0 }
 0x123   : > { %v845_v7 = vmul.f32 %v1041_v5, %v1040_v2  ;;  %v541_v8 = vpop.f32.mrb[6].mxu1  ;;  %v840_v10 = vpop.f32.mrb[7].mxu0 }
 0x124   : > { %v1042_v11 = vadd.f32 %v838_v6, %v541_v8  ;;  %v543_v12 = vpop.f32.mrb[7].mxu1 }
 0x125   : > { %v848_v13 = vadd.f32 %v847_v4, %v845_v7  ;;  %v1043_v14 = vadd.f32 %v840_v10, %v543_v12 }
 0x127   : > { %v846_v15 = vmul.f32 %v1043_v14, %v1042_v11 }
 0x129   : > { %v849_v16 = vadd.f32 %v848_v13, %v846_v15 }
 0x12b   : > { %v850_v17 = vrot.slane %v849_v16, 4 }
 0x12d   : > { %v851_v18 = vadd.f32 %v850_v17, %v849_v16 }
 0x12f   : > { %v852_v19 = vrot.slane %v851_v18, 2  ;;  %861 = sbr.rel (%p1024_p6) target bundleno = 353 (0x161), region = 36 }
 0x131   : > { %v853_v20 = vadd.f32 %v852_v19, %v851_v18 }
 0x133   : > { %v854_v21 = vrot.slane %v853_v20, 1 }
 0x135   : > { %v855_v22 = vadd.f32 %v854_v21, %v853_v20 }
 0x137   : > { %v866_v23 = vadd.f32 0.84729785, %v855_v22 }
 0x139   : > { %v867_v24 = vsub.f32 0.0, %v866_v23 }
 0x13b   : > { %v869_v25 = vand.u32 2147483647, %v867_v24  ;;  %v868_v32 = vmax.f32 %v867_v24, 0.0 }
 0x13d   : > { %v870_v26 = vsub.f32 0.0, %v869_v25 }
 0x13f   : > { %v871_v27 = vmul.f32 1.442695, %v870_v26 }
 0x141   : > { %1121 = vpow2.f32 %v871_v27 }
 0x14b   : > { %v1122_v28 = vpop.eup %1121 }
 0x14c   : > { %v873_v29 = vadd.f32 1.0, %v1122_v28 }
 0x14e   : > { %1123 = vlog2.f32 %v873_v29 }
 0x158   : > { %v1124_v33 = vpop.eup %1123 }
 0x159   : > { %v875_v34 = vmul.f32 0.6931472, %v1124_v33 }
 0x15b   : > { %v876_v35 = vadd.f32 %v875_v34, %v868_v32 }
 0x15d   : > { %v878_v37 = vsel %vm865_vm3, %v876_v35, 0.0 }
 0x15e   : > { %v879_v38 = vadd.f32 %v878_v37, %v877_v36 }
 0x160   : > { %880 = vst [vmem:[#allocation2] sm:$0x1] %v879_v38 }
 0x161 PF: > { %884 = sbr.rel (%p183_p4) target bundleno = 363 (0x16b), region = 40  ;;  %s1027_s4 = sadd.s32 (!%p183_p4), 4294967295, %s1199_s12  ;;  %v890_v41 = vld [vmem:[#allocation3] sm:$0x1] (!%p183_p4) }
 0x162   : > { %s1028_s5 = sshll.u32 (!%p183_p4), %s1027_s4, 7 }
 0x163   : > { %v887_v39 = vstv (!%p183_p4), %s1028_s5 }
 0x164   : > { %v888_v40 = vadd.s32 (!%p183_p4), %v887_v39, %v1279_v9 }
 0x166   : > { %vm889_vm4 = vcmp.lt.s32.totalorder (!%p183_p4), %v888_v40, 16 }
 0x167   : > { %v891_v42 = vsel (!%p183_p4), %vm889_vm4, %v855_v22, 0.0 }
 0x168   : > { %v892_v43 = vadd.f32 %v891_v42, %v890_v41 }
 0x16a   : > { %893 = vst [vmem:[#allocation3] sm:$0x1] %v892_v43 }
 0x16b PF: > { %p1029_p7 = scmp.ne.s32.totalorder %s1199_s12, 1 }
 0x16c   : > { %v898_v44 = vld [vmem:[#allocation2] sm:$0x1] (!%p1029_p7)  ;;  %vm899_vm5 = vcmask (!%p1029_p7), 1040384  }
 0x16d   : > { %897 = sbr.rel (%p1029_p7) target bundleno = 577 (0x241), region = 44  ;;  %v900_v46 = vsel (!%p1029_p7), %vm899_vm5, %v898_v44, 0.0 }
 0x16e   : > { %901 = vadd.xlane.f32.xlu0 (!%p1029_p7), %v900_v46 }
 0x171   : > { %v912_v45 = vld [vmem:[#allocation3] sm:$0x1] (!%p1029_p7) }
 0x172   : > { %v913_v47 = vsel (!%p1029_p7), %vm899_vm5, %v912_v45, 0.0 }
 0x173   : > { %914 = vadd.xlane.f32.xlu0 (!%p1029_p7), %v913_v47 }
 0x1fb   : > { %v902_v48 = vpop.xlane.xlu0 %901 }
 0x1fc   : > { %v903_v49 = vrot.slane %v902_v48, 4 }
 0x1fe   : > { %v904_v50 = vadd.f32 %v903_v49, %v902_v48 }
 0x200   : > { %v915_v9 = vpop.xlane.xlu0 %914  ;;  %v905_v51 = vrot.slane %v904_v50, 2 }
 0x201   : > { %v916_v52 = vrot.slane %v915_v9, 4 }
 0x202   : > { %v906_v54 = vadd.f32 %v905_v51, %v904_v50 }
 0x203   : > { %v917_v53 = vadd.f32 %v916_v52, %v915_v9 }
 0x204   : > { %v907_v56 = vrot.slane %v906_v54, 1 }
 0x205   : > { %v918_v55 = vrot.slane %v917_v53, 2 }
 0x206   : > { %v908_v58 = vadd.f32 %v907_v56, %v906_v54 }
 0x207   : > { %v919_v57 = vadd.f32 %v918_v55, %v917_v53 }
 0x208   : > { %1076 = vpush %v908_v58 }
 0x209   : > { %v920_v59 = vrot.slane %v919_v57, 1 }
 0x20b   : > { %v921_v60 = vadd.f32 %v920_v59, %v919_v57 }
 0x20d   : > { %1078 = vpush %v921_v60 }
 0x239   : > { %s1077_s6 = spop %1076 }
 0x23a   : > { %v910_v61 = vstv %s1077_s6 }
 0x23b   : > { %911 = vst [vmem:[#allocation4] sm:$0xff] %v910_v61 }
 0x23e   : > { %s1079_s7 = spop %1078 }
 0x23f   : > { %v923_v62 = vstv %s1079_s7 }
 0x240   : > { %924 = vst [vmem:[#allocation6] sm:$0xff] %v923_v62 }
 0x241 PF: > { %p1379_p8 = scmp.eq.s32.totalorder %s1010_s15, 1  ;;  %s1212_s9 = smov [#allocation4]  }
 0x242   : > { %s934_s10 = sshll.u32 %s1212_s9, 4  ;;  %s1213_s11 = smov [#allocation6]   ;;  %s935_s10 = int_to_ptr.vmem [resolvable:$true] %s934_s10 }
 0x243   : > { %s947_s12 = sshll.u32 %s1213_s11, 4  ;;  %s1125_s17 = scalar_lea.vmem %s935_s10, 128  ;;  %s1383_s12 = int_to_ptr.vmem [resolvable:$true] %s947_s12 }
 0x244   : > { %p1126_p9 = scmp.ne.s32.totalorder %s935_s10, %s1125_s17  ;;  %p1132_p12 = scmp.lt.s32.totalorder %s935_s10, %s935_s10 }
 0x245   : > { %p1133_p13 = scmp.lt.s32.totalorder %s1125_s17, %s1125_s17 }
 0x246   : > { %p1127_p10 = pnand %p1126_p9, %p1379_p8 }
 0x247   : > { %p1134_p0 = por %p1133_p13, %p1132_p12 }
 0x248   : > { %p1128_p11 = pneg %p1127_p10 }
 0x24a   : > { %p1135_p1 = pnand %p1134_p0, %p1128_p11 }
 0x24c   : > { %1138 = shalt.err (!%p1135_p1)
}
 0x24d   : > { %s1139_s19 = scalar_lea.hbm %s1445_s2, 128 }
 0x24e   : > { %p1140_p2 = scmp.ne.s32.totalorder %s1445_s2, %s1139_s19  ;;  %p1145_p5 = scmp.lt.u32.totalorder %s1139_s19, %s1445_s2 }
 0x250   : > { %p1141_p3 = pnand %p1140_p2, %p1379_p8 }
 0x252   : > { %p1142_p4 = pneg %p1141_p3 }
 0x254   : > { %p1147_p6 = pnand %p1145_p5, %p1142_p4 }
 0x256   : > { %1150 = shalt.err (!%p1147_p6)
}
 0x257   : > { %1081 = dma.vmem_to_hbm [thread:$0]  (%p1379_p8), %s935_s10, 128, %s1445_s2, [#allocation5]  }
 0x258   : > { %s1151_s26 = scalar_lea.vmem %s1383_s12, 128  ;;  %p1158_p11 = scmp.lt.s32.totalorder %s1383_s12, %s1383_s12 }
 0x259   : > { %p1152_p7 = scmp.ne.s32.totalorder %s1383_s12, %s1151_s26  ;;  %p1159_p12 = scmp.lt.s32.totalorder %s1151_s26, %s1151_s26 }
 0x25b   : > { %p1153_p9 = pnand %p1152_p7, %p1379_p8  ;;  %p1160_p13 = por %p1159_p12, %p1158_p11 }
 0x25d   : > { %p1154_p10 = pneg %p1153_p9 }
 0x25f   : > { %p1161_p0 = pnand %p1160_p13, %p1154_p10 }
 0x261   : > { %1164 = shalt.err (!%p1161_p0)
}
 0x262   : > { %s1165_s29 = scalar_lea.hbm %s1446_s3, 128 }
 0x263   : > { %p1166_p1 = scmp.ne.s32.totalorder %s1446_s3, %s1165_s29  ;;  %p1171_p4 = scmp.lt.u32.totalorder %s1165_s29, %s1446_s3 }
 0x265   : > { %p1167_p2 = pnand %p1166_p1, %p1379_p8 }
 0x267   : > { %p1168_p3 = pneg %p1167_p2 }
 0x269   : > { %p1173_p5 = pnand %p1171_p4, %p1168_p3 }
 0x26b   : > { %1176 = shalt.err (!%p1173_p5)
}
 0x26c   : > { %1083 = dma.vmem_to_hbm [thread:$0]  (%p1379_p8), %s1383_s12, 128, %s1446_s3, [#allocation7]  }
 0x26d   : > { %1190 = dma.done.wait (%p1379_p8), [#allocation5], 128  }
 0x26e   : > { %1192 = vsyncadd (%p1379_p8), [#allocation5], 4294967168 }
 0x26f   : > { %1194 = dma.done.wait (%p1379_p8), [#allocation7], 128  }
 0x270   : > { %1196 = vsyncadd (%p1379_p8), [#allocation7], 4294967168 }
 0x271 PF: > { %s16_s14 = sadd.s32 1, %s1207_s14   ;;  %s1448_s12 = smov %s1203_s13 }
 0x272   : > { %p13_p6 = scmp.ge.s32.totalorder %s16_s14, 4   ;;  %s1449_s13 = smov %s1451_s16 }
 0x274   :  { %15 = sbr.rel (!%p13_p6) target bundleno = 3 (0x3), region = 81 }
 0x27b   :  { %964 = vsyncpa [#allocation5], 1 }
 0x27c   :  { %966 = vsyncpa [#allocation5 + $0x1], 1 }
 0x27d   :  { %967 = vsyncpa [#allocation7], 1 }

</bundles_post_ra>
